<compile_context>
chip_gen: v7x
topology: tpu7x:2x2x1
jax: 0.10.0
libtpu: 0.0.40
codegen_flags: <defaults>
</compile_context>

<pallas_src>
import jax
import jax.numpy as jnp
from jax import lax
from jax.experimental import pallas as pl
from jax.experimental.pallas import tpu as pltpu


_LANE = 128
_TV_MAX = 8192          # max vocab-tile width (lanes), streaming path
_TM_MAX = 512           # max row-tile height (sublanes), streaming path
_GATHER_MIN_V = 4096    # switch to the DMA-gather path at/above this vocab
_GATHER_TM = 256        # rows per grid step on the gather path


def _cdiv(a, b):
    return (a + b - 1) // b


def _round_up(x, m):
    return _cdiv(x, m) * m


def _device_budgets():
    """(block_bytes_target, vmem_limit_bytes).

    ~8 MiB blocks / 40 MiB scoped VMEM on v6e/v7x (amortize the ~0.35us
    per-grid-step overhead, stay under v7x's 64 MiB physical VMEM); 4 MiB /
    32 MiB on older, slower-HBM parts where 4 MiB is already ~5us of DMA.
    """
    try:
        kind = jax.devices()[0].device_kind.lower()
    except Exception:
        kind = ""
    for old in ("v2", "v3", "v4", "v5 lite", "v5lite", "v5e"):
        if old in kind:
            return 4 * 1024 * 1024, 32 * 1024 * 1024
    return 8 * 1024 * 1024, 40 * 1024 * 1024


def _choose_tiles(n_rows, vocab, itemsize, block_bytes):
    """(row_tile, vocab_tile) for the streaming path."""
    sub = {4: 8, 2: 16, 1: 32}.get(itemsize, 8)   # sublane tile per dtype
    tv = min(vocab, _TV_MAX)                      # full dim or a multiple of 128
    tm = block_bytes // max(1, tv * itemsize)
    tm = min(tm, _TM_MAX, _round_up(n_rows, sub))
    tm = max(sub, tm // sub * sub)
    # v7x megacore: prefer >= 2 row tiles whenever they stay >= ~64 rows.
    if tm >= n_rows and n_rows >= 128:
        tm = _round_up(_cdiv(n_rows, 2), sub)
    return tm, tv


def _row_gather_streaming(inp2, tgt2):
    """row_vals[r] = inp2[r, tgt2[r]] by streaming the whole (N, V) tensor."""
    N, V = inp2.shape
    block_bytes, vmem_limit = _device_budgets()
    tm, tv = _choose_tiles(N, V, jnp.dtype(inp2.dtype).itemsize, block_bytes)
    grid = (_cdiv(N, tm), _cdiv(V, tv))

    def kernel(inp_ref, tgt_ref, out_ref):
        j = pl.program_id(1)

        @pl.when(j == 0)
        def _():
            out_ref[...] = jnp.zeros_like(out_ref)

        x = inp_ref[...]                              # (tm, tv), input dtype
        tgt = tgt_ref[...]                            # (tm, 1) int32
        # Fold the target-validity guard into the per-row adjusted target
        # ((tm,1) ops only): -1 never matches a local column id, so
        # out-of-range targets / garbage boundary columns contribute 0.
        adj = jnp.where((tgt >= 0) & (tgt < V), tgt - j * tv, -1)
        ids = lax.broadcasted_iota(jnp.int32, x.shape, 1)
        picked = jnp.where(ids == adj, x, jnp.zeros_like(x))
        # <=1 nonzero per row -> the reduce is exact in the input dtype;
        # only the (tm,1) row sums are cast to f32 (keeps bf16 memory-bound).
        out_ref[...] += jnp.sum(picked, axis=1, keepdims=True).astype(jnp.float32)

    return pl.pallas_call(
        kernel,
        out_shape=jax.ShapeDtypeStruct((N, 1), jnp.float32),
        grid_spec=pltpu.PrefetchScalarGridSpec(
            num_scalar_prefetch=0,
            grid=grid,
            in_specs=[
                pl.BlockSpec((tm, tv), lambda i, j: (i, j)),
                pl.BlockSpec((tm, 1), lambda i, j: (i, 0)),
            ],
            out_specs=pl.BlockSpec((tm, 1), lambda i, j: (i, 0)),
        ),
        compiler_params=pltpu.CompilerParams(
            dimension_semantics=("parallel", "arbitrary"),
            vmem_limit_bytes=vmem_limit,
        ),
    )(inp2, tgt2)


def _row_gather_dma(inp2, tgt2):
    """row_vals[r] = inp2[r, tgt2[r]] reading only the 128-lane slab that
    contains each target (input stays in HBM; ~V/128x less HBM traffic)."""
    N, V = inp2.shape
    tm = min(_GATHER_TM, _round_up(N, 8))
    grid = (_cdiv(N, tm),)
    tgt1 = tgt2.reshape(N)                            # scalar-prefetch copy (SMEM)

    def slab_of(t):
        # 128-lane-aligned slab start, clamped so slab + 128 <= V.
        return jnp.minimum((t // _LANE) * _LANE, V - _LANE)

    def kernel(tgt_smem, tgt_ref, inp_hbm, out_ref, buf, sem):
        i = pl.program_id(0)
        nsteps = pl.num_programs(0)

        def issue(step, slot):
            base = step * tm

            def body(r, carry):
                row = jnp.minimum(base + r, N - 1)     # clamp: never OOB DMA
                t = jnp.clip(tgt_smem[row], 0, V - 1)
                pltpu.make_async_copy(
                    inp_hbm.at[pl.ds(row, 1), pl.ds(slab_of(t), _LANE)],
                    buf.at[slot, pl.ds(r, 1)],
                    sem.at[slot],
                ).start()
                return carry

            lax.fori_loop(0, tm, body, 0)

        # Prime the pipeline, then keep one row tile of DMAs in flight.
        @pl.when(i == 0)
        def _():
            issue(0, 0)

        @pl.when(i + 1 < nsteps)
        def _():
            issue(i + 1, (i + 1) % 2)

        slot = i % 2

        def wait_body(r, carry):
            pltpu.make_async_copy(                     # shape-only wait descriptor
                inp_hbm.at[pl.ds(0, 1), pl.ds(0, _LANE)],
                buf.at[slot, pl.ds(0, 1)],
                sem.at[slot],
            ).wait()
            return carry

        lax.fori_loop(0, tm, wait_body, 0)

        # Lane-select tgt - slab inside each row's fetched 128-lane slab.
        t_vec = jnp.clip(tgt_ref[...], 0, V - 1)       # (tm, 1) int32
        lane_idx = t_vec - slab_of(t_vec)              # (tm, 1) in [0, 128)
        lanes = lax.broadcasted_iota(jnp.int32, (tm, _LANE), 1)
        x = buf[slot]                                  # (tm, 128)
        picked = jnp.where(lanes == lane_idx, x, jnp.zeros_like(x))
        out_ref[...] = jnp.sum(picked, axis=1, keepdims=True).astype(jnp.float32)

    return pl.pallas_call(
        kernel,
        out_shape=jax.ShapeDtypeStruct((N, 1), jnp.float32),
        grid_spec=pltpu.PrefetchScalarGridSpec(
            num_scalar_prefetch=1,
            grid=grid,
            in_specs=[
                pl.BlockSpec((tm, 1), lambda i, tgt: (i, 0)),
                pl.BlockSpec(memory_space=pl.ANY),     # (N, V) stays in HBM
            ],
            out_specs=pl.BlockSpec((tm, 1), lambda i, tgt: (i, 0)),
            scratch_shapes=[
                pltpu.VMEM((2, tm, _LANE), inp2.dtype),
                pltpu.SemaphoreType.DMA((2,)),
            ],
        ),
        compiler_params=pltpu.CompilerParams(
            # Cross-step double-buffering carries state -> "arbitrary".
            dimension_semantics=("arbitrary",),
        ),
    )(tgt1, tgt2, inp2)


def language_model_criterion(inp, target, mask):
    """Pallas equivalent of LanguageModelCriterion.forward.

    inp:    (B, T, V) float32 or bfloat16 (log-probs)
    target: (B, T)    integer
    mask:   (B, T)    float
    returns scalar f32: sum(inp.gather(-1, target) * mask) / sum(mask)
    """
    B, T, V = inp.shape
    N = B * T
    inp2 = inp.reshape(N, V)
    tgt2 = target.reshape(N, 1).astype(jnp.int32)
    msk2 = mask.reshape(N, 1).astype(jnp.float32)

    if V >= max(_GATHER_MIN_V, _LANE):
        row_vals = _row_gather_dma(inp2, tgt2)
    else:
        row_vals = _row_gather_streaming(inp2, tgt2)

    num = jnp.sum(row_vals * msk2)     # mask applied once, in the wrapper
    den = jnp.sum(msk2)
    return num / den


def _reference(inp, target, mask):
    V = inp.shape[-1]
    g = jnp.take_along_axis(inp.reshape(-1, V).astype(jnp.float32),
                            target.reshape(-1, 1), axis=1)
    m = mask.reshape(-1, 1).astype(jnp.float32)
    return jnp.sum(g * m) / jnp.sum(m)


if __name__ == "__main__":
    key = jax.random.PRNGKey(0)
    k1, k2, k3, k4, k5, k6, k7 = jax.random.split(key, 7)

    # Case 1: small shapes matching the module's intended use (streaming path).
    B, T, V = 2, 8, 32
    logits = jax.random.normal(k1, (B, T, V), dtype=jnp.float32)
    inp_a = jax.nn.log_softmax(logits, axis=-1)
    target_a = jax.random.randint(k2, (B, T), 0, V, dtype=jnp.int32)
    mask_a = jnp.concatenate(
        [jnp.ones((1, T), jnp.float32),
         jnp.concatenate([jnp.ones((1, T // 2), jnp.float32),
                          jnp.zeros((1, T - T // 2), jnp.float32)], axis=1)],
        axis=0)
    out_a = jax.block_until_ready(language_model_criterion(inp_a, target_a, mask_a))
    ref_a = _reference(inp_a, target_a, mask_a)
    assert jnp.allclose(out_a, ref_a, rtol=1e-5, atol=1e-6), (out_a, ref_a)

    # Case 2: large vocab -> DMA-gather path; N % 8 != 0 exercises boundary rows.
    B2, T2, V2 = 3, 7, 20000
    logits2 = jax.random.normal(k3, (B2, T2, V2), dtype=jnp.float32)
    inp_b = jax.nn.log_softmax(logits2, axis=-1)
    target_b = jax.random.randint(k4, (B2, T2), 0, V2, dtype=jnp.int32)
    mask_b = (jax.random.uniform(k5, (B2, T2)) > 0.3).astype(jnp.float32)
    mask_b = mask_b.at[0, 0].set(1.0)   # guarantee sum(mask) > 0
    out_b = jax.block_until_ready(language_model_criterion(inp_b, target_b, mask_b))
    ref_b = _reference(inp_b, target_b, mask_b)
    assert jnp.allclose(out_b, ref_b, rtol=1e-5, atol=1e-6), (out_b, ref_b)

    # Case 3: bf16 input on the streaming path (16-row sublane tiles, bf16 reduce).
    B3, T3, V3 = 2, 8, 512
    logits3 = jax.random.normal(k6, (B3, T3, V3), dtype=jnp.float32)
    inp_c = jax.nn.log_softmax(logits3, axis=-1).astype(jnp.bfloat16)
    target_c = jax.random.randint(k7, (B3, T3), 0, V3, dtype=jnp.int32)
    mask_c = jnp.ones((B3, T3), jnp.float32)
    out_c = jax.block_until_ready(language_model_criterion(inp_c, target_c, mask_c))
    ref_c = _reference(inp_c, target_c, mask_c)
    assert jnp.allclose(out_c, ref_c, rtol=1e-4, atol=1e-5), (out_c, ref_c)

    print("KERNEL_OK")
</pallas_src>

<mosaic_0001>
module attributes {stable_mosaic.version = 11 : i64} {
  func.func @kernel(%arg0: i32, %arg1: i32, %arg2: memref<16x32xf32, #tpu.memory_space<vmem>>, %arg3: memref<16x1xi32, #tpu.memory_space<vmem>>, %arg4: memref<16x1xf32, #tpu.memory_space<vmem>>) attributes {dimension_semantics = [#tpu.dimension_semantics<parallel>, #tpu.dimension_semantics<arbitrary>], iteration_bounds = array<i64: 1, 1>, scalar_prefetch = 0 : i64, scratch_operands = 0 : i64, tpu.core_type = #tpu.core_type<tc>, window_params = [{transform_indices = @transform_0, window_bounds = array<i64: 16, 32>}, {transform_indices = @transform_1, window_bounds = array<i64: 16, 1>}, {transform_indices = @transform_2, window_bounds = array<i64: 16, 1>}]} {
    %c0_i32 = arith.constant 0 : i32
    %0 = arith.cmpi eq, %arg1, %c0_i32 : i32
    %1 = arith.extui %0 : i1 to i32
    %c0_i32_0 = arith.constant 0 : i32
    %2 = arith.cmpi ne, %1, %c0_i32_0 : i32
    scf.if %2 {
      %cst_11 = arith.constant 0.000000e+00 : f32
      %25 = vector.broadcast %cst_11 : f32 to vector<16x1xf32>
      %c0_12 = arith.constant 0 : index
      %c0_13 = arith.constant 0 : index
      %26 = vector.load %arg4[%c0_12, %c0_13] : memref<16x1xf32, #tpu.memory_space<vmem>>, vector<16x1xf32>
      tpu.vector_store %arg4[%c0_12, %c0_13], %25 {strides = array<i32>} : memref<16x1xf32, #tpu.memory_space<vmem>>, vector<16x1xf32>,
    } else {
    }
    %c0 = arith.constant 0 : index
    %c0_1 = arith.constant 0 : index
    %3 = vector.load %arg2[%c0, %c0_1] : memref<16x32xf32, #tpu.memory_space<vmem>>, vector<16x32xf32>
    %c0_2 = arith.constant 0 : index
    %c0_3 = arith.constant 0 : index
    %4 = vector.load %arg3[%c0_2, %c0_3] : memref<16x1xi32, #tpu.memory_space<vmem>>, vector<16x1xi32>
    %c0_i32_4 = arith.constant 0 : i32
    %5 = vector.broadcast %c0_i32_4 : i32 to vector<16x1xi32>
    %6 = arith.cmpi sge, %4, %5 : vector<16x1xi32>
    %c32_i32 = arith.constant 32 : i32
    %7 = vector.broadcast %c32_i32 : i32 to vector<16x1xi32>
    %8 = arith.cmpi slt, %4, %7 : vector<16x1xi32>
    %9 = arith.andi %6, %8 : vector<16x1xi1>
    %c32_i32_5 = arith.constant 32 : i32
    %10 = arith.muli %arg1, %c32_i32_5 : i32
    %11 = vector.broadcast %10 : i32 to vector<16x1xi32>
    %12 = arith.subi %4, %11 : vector<16x1xi32>
    %c-1_i32 = arith.constant -1 : i32
    %13 = vector.broadcast %c-1_i32 : i32 to vector<16x1xi32>
    %14 = arith.select %9, %12, %13 : vector<16x1xi1>, vector<16x1xi32>
    %15 = tpu.iota {dimensions = array<i32: 1>} : vector<16x32xi32>
    %16 = vector.broadcast %14 : vector<16x1xi32> to vector<16x32xi32>
    %17 = arith.cmpi eq, %15, %16 : vector<16x32xi32>
    %cst = arith.constant 0.000000e+00 : f32
    %18 = vector.broadcast %cst : f32 to vector<16x32xf32>
    %19 = arith.select %17, %3, %18 : vector<16x32xi1>, vector<16x32xf32>
    %c0_6 = arith.constant 0 : index
    %c0_7 = arith.constant 0 : index
    %20 = vector.load %arg4[%c0_6, %c0_7] : memref<16x1xf32, #tpu.memory_space<vmem>>, vector<16x1xf32>
    %cst_8 = arith.constant dense<0.000000e+00> : vector<16xf32>
    %21 = vector.multi_reduction <add>, %19, %cst_8 [1] : vector<16x32xf32> to vector<16xf32>
    %22 = vector.shape_cast %21 : vector<16xf32> to vector<16x1xf32>
    %23 = arith.addf %20, %22 : vector<16x1xf32>
    %c0_9 = arith.constant 0 : index
    %c0_10 = arith.constant 0 : index
    %24 = vector.load %arg4[%c0_9, %c0_10] : memref<16x1xf32, #tpu.memory_space<vmem>>, vector<16x1xf32>
    tpu.vector_store %arg4[%c0_9, %c0_10], %23 {strides = array<i32>} : memref<16x1xf32, #tpu.memory_space<vmem>>, vector<16x1xf32>,
    return
  }
  func.func @transform_0(%arg0: i32, %arg1: i32) -> (i32, i32) {
    %c0_i32 = arith.constant 0 : i32
    return %arg0, %arg1 : i32, i32
  }
  func.func @transform_1(%arg0: i32, %arg1: i32) -> (i32, i32) {
    %c0_i32 = arith.constant 0 : i32
    %c0_i32_0 = arith.constant 0 : i32
    return %arg0, %c0_i32 : i32, i32
  }
  func.func @transform_2(%arg0: i32, %arg1: i32) -> (i32, i32) {
    %c0_i32 = arith.constant 0 : i32
    %c0_i32_0 = arith.constant 0 : i32
    return %arg0, %c0_i32 : i32, i32
  }
}

</mosaic_0001>

<bundles_post_ra>
// kernel: tpu_custom_call.1
= control target key start
LH: loop header
LB: loop body
LE: loop exit
PB: predicated region body
PF: predicated region fallthrough
CT: control target
= control target key end

     0   :  { %v67_v0 = vmov 0   ;;  %vm15_vm6 = vcmask 7168   ;;  %v68_v5 = vmov 0.0   ;;  %v34_v6 = vlaneseq  ;;  %s118_s1 = inlined_call_operand.vmem [shape: s32[16,1], index: 1, kind: input, shape index: {}]   ;;  %s119_s2 = inlined_call_operand.vmem [shape: f32[16,1], index: 2, kind: output, shape index: {}]   ;;  %s120_s0 = inlined_call_operand.vmem [shape: f32[16,32], index: 0, kind: input, shape index: {}]  }
   0x1   :  { %66 = vset.pattern.permute.xlu0 %v67_v0  ;;  %v20_v1 = vld [vmem:[%s118_s1] sm:$0xff]  ;;  %v21_v2 = vld [vmem:[%s118_s1 + $0x8] sm:$0xff]  ;;  %16 = vst.msk [vmem:[%s119_s2] sm:$0xff] %vm15_vm6, %v68_v5  ;;  %17 = vst.msk [vmem:[%s119_s2 + $0x8] sm:$0xff] %vm15_vm6, %v68_v5  ;;  %vm48_vm7 = vcmask 261120  }
   0x2   :  { %vm22_vm0 = vcmp.ge.s32.totalorder %v20_v1, 0  ;;  %vm24_vm1 = vcmp.lt.s32.totalorder %v20_v1, 32  ;;  %vm23_vm2 = vcmp.ge.s32.totalorder %v21_v2, 0  ;;  %vm25_vm3 = vcmp.lt.s32.totalorder %v21_v2, 32  ;;  %v18_v8 = vld [vmem:[%s120_s0] sm:$0xff]  ;;  %v19_v12 = vld [vmem:[%s120_s0 + $0x8] sm:$0xff] }
   0x3   :  { %vm26_vm4 = vmand %vm22_vm0, %vm24_vm1  ;;  %v35_v7 = vand.u32 127, %v34_v6 }
   0x4   :  { %v32_v3 = vsel %vm26_vm4, %v20_v1, 4294967295  ;;  %vm27_vm5 = vmand %vm23_vm2, %vm25_vm3 }
   0x5   :  { %37 = vperm.xlu0 %66, %v32_v3   ;;  %v33_v4 = vsel %vm27_vm5, %v21_v2, 4294967295 }
   0x8   :  { %v46_v16 = vld [vmem:[%s119_s2] sm:$0xff]  ;;  %v47_v19 = vld [vmem:[%s119_s2 + $0x8] sm:$0xff] }
   0x9   :  { %40 = vperm.xlu0 %66, %v33_v4  }
  0x84   :  { %v38_v9 = vpop.permute.xlu0 %37 }
  0x85   :  { %vm42_vm8 = vcmp.eq.s32.totalorder %v35_v7, %v38_v9 }
  0x86   :  { %v44_v10 = vsel %vm42_vm8, %v18_v8, 0.0 }
  0x87   :  { %v49_v11 = vsel %vm48_vm7, %v44_v10, 0.0 }
  0x88   :  { %v41_v13 = vpop.permute.xlu0 %40  ;;  %50 = vadd.xlane.f32.xlu1 %v49_v11 }
  0x89   :  { %vm43_vm9 = vcmp.eq.s32.totalorder %v35_v7, %v41_v13 }
  0x8a   :  { %v45_v14 = vsel %vm43_vm9, %v19_v12, 0.0 }
  0x8b   :  { %v52_v15 = vsel %vm48_vm7, %v45_v14, 0.0 }
  0x8c   :  { %53 = vadd.xlane.f32.xlu1 %v52_v15 }
 0x115   :  { %v51_v17 = vpop.xlane.xlu1 %50 }
 0x116   :  { %v55_v18 = vadd.f32 %v51_v17, %v46_v16 }
 0x118   :  { %58 = vst.msk [vmem:[%s119_s2] sm:$0xff] %vm15_vm6, %v55_v18 }
 0x119   :  { %v54_v20 = vpop.xlane.xlu1 %53 }
 0x11a   :  { %v56_v21 = vadd.f32 %v54_v20, %v47_v19 }
 0x11c   :  { %59 = vst.msk [vmem:[%s119_s2 + $0x8] sm:$0xff] %vm15_vm6, %v56_v21 }

</bundles_post_ra>
